<compile_context>
chip_gen: v7x
topology: tpu7x:2x2x1
jax: 0.10.0
libtpu: 0.0.40
codegen_flags: <defaults>
</compile_context>

<pallas_src>
import functools

import jax
import jax.numpy as jnp
from jax.experimental import pallas as pl
from jax.experimental.pallas import tpu as pltpu

NEG_SLOPE = 0.01  # nn.LeakyReLU default
LANE = 128        # TPU lane width (last dim)
SUBLANE = 8       # TPU sublane width (second-to-last dim, f32)


def _round_up(n, m):
    return ((n + m - 1) // m) * m


def _pad2d(a, rows, cols):
    r, c = a.shape
    if r == rows and c == cols:
        return a
    return jnp.pad(a, ((0, rows - r), (0, cols - c)))


def _leaky_relu(x):
    # max(x, 0.01*x) == LeakyReLU for slope in [0,1]; one fewer VALU op than
    # compare+select.
    return jnp.maximum(x, NEG_SLOPE * x)


def _mlp_kernel(x_ref, w1_ref, b1_ref, w2_ref, b2_ref, w3_ref, b3_ref, o_ref,
                *, matmul_dtype):
    """Fused fc1 -> LeakyReLU -> fc2 -> LeakyReLU -> fc3 on one (TB, ·) tile.

    Weights arrive already in matmul_dtype (pre-cast in prepare_params), so the
    only per-step casts are on the batch-scaled tensors feeding the MXU.
    Accumulation, bias add and LeakyReLU are f32.
    """
    x = x_ref[...].astype(matmul_dtype)

    h1 = jnp.dot(x, w1_ref[...], preferred_element_type=jnp.float32) + b1_ref[...]
    h1 = _leaky_relu(h1)

    h2 = jnp.dot(h1.astype(matmul_dtype), w2_ref[...],
                 preferred_element_type=jnp.float32) + b2_ref[...]
    h2 = _leaky_relu(h2)

    out = jnp.dot(h2.astype(matmul_dtype), w3_ref[...],
                  preferred_element_type=jnp.float32) + b3_ref[...]
    o_ref[...] = out.astype(o_ref.dtype)


def prepare_params(params, *, matmul_dtype=jnp.float32, x_dtype=None):
    """Pad (and cast) the weights ONCE, outside the sampling loop.

    A diffusion forward runs hundreds of times per sample; doing this per call
    re-materializes padded copies in HBM every step for invariant data.
    """
    d_in, hidden = params["w1"].shape
    d_out = params["w3"].shape[1]
    x_dtype = matmul_dtype if x_dtype is None else x_dtype

    # Only the first matmul's contraction dim (d_in): pad to 16 (sublane-safe
    # for f32 and bf16), NOT to 128 -- x is the only operand that scales with
    # batch, so inflating it to 128 lanes would be ~10x extra HBM traffic.
    d_in_p = _round_up(d_in, 2 * SUBLANE)
    h_p = _round_up(hidden, LANE)       # lane-dense hidden
    d_out_p = _round_up(d_out, LANE)    # lane-dense output (unmasked vst)

    prepped = {
        "w1": _pad2d(params["w1"], d_in_p, h_p).astype(matmul_dtype),
        "b1": _pad2d(params["b1"], 1, h_p).astype(jnp.float32),
        "w2": _pad2d(params["w2"], h_p, h_p).astype(matmul_dtype),
        "b2": _pad2d(params["b2"], 1, h_p).astype(jnp.float32),
        "w3": _pad2d(params["w3"], h_p, d_out_p).astype(matmul_dtype),
        "b3": _pad2d(params["b3"], 1, d_out_p).astype(jnp.float32),
    }
    if "embedding" in params:
        prepped["embedding"] = params["embedding"]

    meta = dict(d_in=d_in, hidden=hidden, d_out=d_out,
                d_in_p=d_in_p, h_p=h_p, d_out_p=d_out_p,
                matmul_dtype=matmul_dtype, x_dtype=x_dtype)
    return prepped, meta


def diffusion_mlp_pallas(x, prepped, meta, *, block_batch=None,
                         out_dtype=jnp.float32, core_parallel=False,
                         vmem_cap_bytes=48 << 20):
    """x: [B, input_dim + embedding_dim]. Returns [B, output_dim] (out_dtype)."""
    B, d_in = x.shape
    assert d_in == meta["d_in"], "x feature dim does not match prepared params"
    d_in_p, h_p, d_out_p = meta["d_in_p"], meta["h_p"], meta["d_out_p"]
    hidden, d_out = meta["hidden"], meta["d_out"]
    matmul_dtype = meta["matmul_dtype"]
    x_dtype = meta["x_dtype"]

    x_bytes = jnp.dtype(x_dtype).itemsize
    w_elt_bytes = jnp.dtype(matmul_dtype).itemsize
    align = SUBLANE * max(1, 4 // x_bytes)   # 8 rows for f32 x, 16 for bf16 x

    # Batch tile: one grid step for small B (no per-step overhead), up to 1024
    # rows per step for large B (each step costs ~0.35 us fixed overhead and
    # small tiles under-fill the MXU).
    if block_batch is None:
        block_batch = min(1024, _round_up(B, align))
    tb = max(align, _round_up(block_batch, align))
    b_p = _round_up(B, tb)
    grid = (b_p // tb,)

    x_p = _pad2d(x, b_p, d_in_p).astype(x_dtype)

    def x_map(i):
        return (i, 0)

    def const_map(i):
        return (0, 0)

    # VMEM budget: weights counted ONCE (single-buffered constants), x/out
    # tiles double-buffered, f32 intermediates + their matmul-dtype copies.
    w_bytes = (w_elt_bytes * (d_in_p * h_p + h_p * h_p + h_p * d_out_p)
               + 4 * (2 * h_p + d_out_p))
    tile_bytes = x_bytes * tb * d_in_p + 4 * tb * d_out_p
    interm_bytes = (4 * tb * h_p * 2                       # h1, h2 in f32
                    + w_elt_bytes * tb * (d_in_p + 2 * h_p))  # MXU-dtype copies
    vmem_limit = int(min(w_bytes + 2 * tile_bytes + interm_bytes + (4 << 20),
                         vmem_cap_bytes))

    # Advisory cost from TRUE (un-padded) dims so XLA does not over-serialize
    # the surrounding glue (embedding gather, concat).
    flops = 2 * B * (d_in * hidden + hidden * hidden + hidden * d_out)
    bytes_accessed = (x_bytes * B * d_in
                      + jnp.dtype(out_dtype).itemsize * B * d_out
                      + w_elt_bytes * (d_in * hidden + hidden * hidden + hidden * d_out)
                      + 4 * (2 * hidden + d_out))

    kernel = functools.partial(_mlp_kernel, matmul_dtype=matmul_dtype)
    # On v7x (2 TensorCores) pass core_parallel=True with a >1-step grid so the
    # batch axis is sharded across cores; plain "parallel" elsewhere.
    sem = pltpu.CORE_PARALLEL if core_parallel else "parallel"

    def run(weight_mode):
        kw = {} if weight_mode is None else {"pipeline_mode": weight_mode}
        in_specs = [
            pl.BlockSpec((tb, d_in_p), x_map),              # x: tiled over batch
            pl.BlockSpec((d_in_p, h_p), const_map, **kw),   # w1: VMEM-resident
            pl.BlockSpec((1, h_p), const_map, **kw),        # b1
            pl.BlockSpec((h_p, h_p), const_map, **kw),      # w2
            pl.BlockSpec((1, h_p), const_map, **kw),        # b2
            pl.BlockSpec((h_p, d_out_p), const_map, **kw),  # w3
            pl.BlockSpec((1, d_out_p), const_map, **kw),    # b3
        ]
        return pl.pallas_call(
            kernel,
            out_shape=jax.ShapeDtypeStruct((b_p, d_out_p), out_dtype),
            grid=grid,
            in_specs=in_specs,
            out_specs=pl.BlockSpec((tb, d_out_p), x_map),
            compiler_params=pltpu.CompilerParams(
                dimension_semantics=(sem,),
                vmem_limit_bytes=vmem_limit,
            ),
            cost_estimate=pl.CostEstimate(
                flops=flops, transcendentals=0,
                bytes_accessed=int(bytes_accessed)),
        )(x_p, prepped["w1"], prepped["b1"], prepped["w2"], prepped["b2"],
          prepped["w3"], prepped["b3"])

    try:
        # Constant-index blocks need no double buffering: single-buffer the
        # resident weights/biases so their VMEM footprint is paid once.
        out_p = run(pl.Buffered(1))
    except Exception:
        # Fallback for Pallas versions that reject Buffered(1) on a
        # pallas_call operand: default buffering, identical numerics.
        out_p = run(None)

    return out_p[:B, :d_out]


def init_params(key, input_dim, hidden_dim, output_dim,
                num_classes=None, embedding_dim=0, is_conditional=False):
    """Deterministic synthetic parameter init (matches PyTorch module shapes)."""
    keys = jax.random.split(key, 8)
    d_in = input_dim + embedding_dim

    def lin(kw, kb, fan_in, fan_out):
        bound = 1.0 / jnp.sqrt(fan_in)
        w = jax.random.uniform(kw, (fan_in, fan_out), jnp.float32, -bound, bound)
        b = jax.random.uniform(kb, (1, fan_out), jnp.float32, -bound, bound)
        return w, b

    w1, b1 = lin(keys[0], keys[1], d_in, hidden_dim)
    w2, b2 = lin(keys[2], keys[3], hidden_dim, hidden_dim)
    w3, b3 = lin(keys[4], keys[5], hidden_dim, output_dim)
    params = {"w1": w1, "b1": b1, "w2": w2, "b2": b2, "w3": w3, "b3": b3}
    if is_conditional:
        params["embedding"] = jax.random.normal(
            keys[6], (num_classes, embedding_dim), jnp.float32)
    return params


def diffusion_model_forward(prepped, meta, xt, t, class_labels=None,
                            is_conditional=False, **mlp_kwargs):
    """Mirrors DiffusionModel.forward: concat(xt, t[, emb(labels)]) -> MLP."""
    if is_conditional:
        emb = jnp.take(prepped["embedding"], class_labels, axis=0)  # [B, emb_dim]
        x = jnp.concatenate([xt, t, emb], axis=1)
    else:
        x = jnp.concatenate([xt, t], axis=1)
    return diffusion_mlp_pallas(x, prepped, meta, **mlp_kwargs)


def _reference_forward(params, xt, t, class_labels=None, is_conditional=False):
    """Pure-JAX reference for correctness checking."""
    if is_conditional:
        emb = jnp.take(params["embedding"], class_labels, axis=0)
        x = jnp.concatenate([xt, t, emb], axis=1)
    else:
        x = jnp.concatenate([xt, t], axis=1)
    h1 = _leaky_relu(x @ params["w1"] + params["b1"])
    h2 = _leaky_relu(h1 @ params["w2"] + params["b2"])
    return h2 @ params["w3"] + params["b3"]


if __name__ == "__main__":
    # Small shapes: xt has 7 data dims, t is 1 dim => input_dim = 8 (matches
    # torch.cat([xt, t], dim=1) feeding nn.Linear(input_dim + embedding_dim, .)).
    batch = 64
    data_dim = 7
    input_dim = data_dim + 1
    hidden_dim = 32
    output_dim = data_dim
    num_classes = 10
    embedding_dim = 4
    is_conditional = True

    key = jax.random.PRNGKey(0)
    kp, kx, kt, kc = jax.random.split(key, 4)

    params = init_params(kp, input_dim, hidden_dim, output_dim,
                         num_classes=num_classes,
                         embedding_dim=embedding_dim,
                         is_conditional=is_conditional)

    xt = jax.random.normal(kx, (batch, data_dim), jnp.float32)
    t = jax.random.uniform(kt, (batch, 1), jnp.float32)
    class_labels = jax.random.randint(kc, (batch,), 0, num_classes)

    ref = _reference_forward(params, xt, t, class_labels,
                             is_conditional=is_conditional)

    # f32 MXU path: params padded ONCE (hoisted out of the per-step call);
    # default tiling gives a single grid step at this batch size.
    prepped_f32, meta_f32 = prepare_params(params, matmul_dtype=jnp.float32)
    out = diffusion_model_forward(prepped_f32, meta_f32, xt, t, class_labels,
                                  is_conditional=is_conditional)
    out = jax.block_until_ready(out)
    assert out.shape == (batch, output_dim)
    assert jnp.allclose(out, ref, atol=1e-5, rtol=1e-5), "f32 mismatch vs reference"

    # bf16-operand MXU path (native on v5e/v6e/v7x): weights pre-cast once in
    # prepare_params, x cast once in the wrapper; f32 accumulation + f32
    # bias/LeakyReLU epilogue -> only operand rounding differs (loose tol).
    # (Pass x_dtype=jnp.float32 to prepare_params if raw large-magnitude
    # timesteps are concatenated into x.)
    prepped_bf16, meta_bf16 = prepare_params(params, matmul_dtype=jnp.bfloat16)
    out_bf16 = diffusion_model_forward(prepped_bf16, meta_bf16, xt, t,
                                       class_labels,
                                       is_conditional=is_conditional)
    out_bf16 = jax.block_until_ready(out_bf16)
    assert out_bf16.shape == (batch, output_dim)
    assert jnp.allclose(out_bf16, ref, atol=5e-2, rtol=5e-2), "bf16 mismatch vs reference"

    # Multi-step grid correctness check (2 steps of 32 rows): exercises the
    # pipelined batch grid with VMEM-resident weights.  This block size is for
    # testing only -- real workloads should use the default (512-1024 rows).
    out_tiled = diffusion_model_forward(prepped_f32, meta_f32, xt, t,
                                        class_labels,
                                        is_conditional=is_conditional,
                                        block_batch=32)
    out_tiled = jax.block_until_ready(out_tiled)
    assert jnp.allclose(out_tiled, ref, atol=1e-5, rtol=1e-5), "tiled mismatch vs reference"

    print("KERNEL_OK")
</pallas_src>

<mosaic_0001>
module attributes {stable_mosaic.version = 11 : i64} {
  func.func @_mlp_kernel(%arg0: i32, %arg1: memref<64x16xf32, #tpu.memory_space<vmem>>, %arg2: memref<16x128xf32, #tpu.memory_space<vmem>>, %arg3: memref<1x128xf32, #tpu.memory_space<vmem>>, %arg4: memref<128x128xf32, #tpu.memory_space<vmem>>, %arg5: memref<1x128xf32, #tpu.memory_space<vmem>>, %arg6: memref<128x128xf32, #tpu.memory_space<vmem>>, %arg7: memref<1x128xf32, #tpu.memory_space<vmem>>, %arg8: memref<64x128xf32, #tpu.memory_space<vmem>>) attributes {dimension_semantics = [#tpu.dimension_semantics<parallel>], iteration_bounds = array<i64: 1>, scalar_prefetch = 0 : i64, scratch_operands = 0 : i64, tpu.core_type = #tpu.core_type<tc>, window_params = [{transform_indices = @transform_0, window_bounds = array<i64: 64, 16>}, {pipeline_mode = #tpu.pipeline_mode<synchronous>, transform_indices = @transform_1, window_bounds = array<i64: 16, 128>}, {pipeline_mode = #tpu.pipeline_mode<synchronous>, transform_indices = @transform_2, window_bounds = array<i64: 1, 128>}, {pipeline_mode = #tpu.pipeline_mode<synchronous>, transform_indices = @transform_3, window_bounds = array<i64: 128, 128>}, {pipeline_mode = #tpu.pipeline_mode<synchronous>, transform_indices = @transform_4, window_bounds = array<i64: 1, 128>}, {pipeline_mode = #tpu.pipeline_mode<synchronous>, transform_indices = @transform_5, window_bounds = array<i64: 128, 128>}, {pipeline_mode = #tpu.pipeline_mode<synchronous>, transform_indices = @transform_6, window_bounds = array<i64: 1, 128>}, {transform_indices = @transform_7, window_bounds = array<i64: 64, 128>}]} {
    %c0 = arith.constant 0 : index
    %c0_0 = arith.constant 0 : index
    %0 = vector.load %arg1[%c0, %c0_0] : memref<64x16xf32, #tpu.memory_space<vmem>>, vector<64x16xf32>
    %c0_1 = arith.constant 0 : index
    %c0_2 = arith.constant 0 : index
    %1 = vector.load %arg2[%c0_1, %c0_2] : memref<16x128xf32, #tpu.memory_space<vmem>>, vector<16x128xf32>
    %cst = arith.constant dense<0.000000e+00> : vector<64x128xf32>
    %2 = tpu.matmul %0, %1, %cst {dimension_numbers = #tpu.dot_dimension_numbers<[1], [0], [0], [1], [0, 0, 1, 1], [], []>} : vector<64x16xf32>, vector<16x128xf32>, vector<64x128xf32> -> vector<64x128xf32>
    %c0_3 = arith.constant 0 : index
    %c0_4 = arith.constant 0 : index
    %3 = vector.load %arg3[%c0_3, %c0_4] : memref<1x128xf32, #tpu.memory_space<vmem>>, vector<1x128xf32>
    %4 = vector.broadcast %3 : vector<1x128xf32> to vector<64x128xf32>
    %5 = arith.addf %2, %4 : vector<64x128xf32>
    %cst_5 = arith.constant 0.00999999977 : f32
    %6 = vector.broadcast %cst_5 : f32 to vector<64x128xf32>
    %7 = arith.mulf %6, %5 : vector<64x128xf32>
    %8 = arith.maximumf %5, %7 : vector<64x128xf32>
    %c0_6 = arith.constant 0 : index
    %c0_7 = arith.constant 0 : index
    %9 = vector.load %arg4[%c0_6, %c0_7] : memref<128x128xf32, #tpu.memory_space<vmem>>, vector<128x128xf32>
    %cst_8 = arith.constant dense<0.000000e+00> : vector<64x128xf32>
    %10 = tpu.matmul %8, %9, %cst_8 {dimension_numbers = #tpu.dot_dimension_numbers<[1], [0], [0], [1], [0, 0, 1, 1], [], []>} : vector<64x128xf32>, vector<128x128xf32>, vector<64x128xf32> -> vector<64x128xf32>
    %c0_9 = arith.constant 0 : index
    %c0_10 = arith.constant 0 : index
    %11 = vector.load %arg5[%c0_9, %c0_10] : memref<1x128xf32, #tpu.memory_space<vmem>>, vector<1x128xf32>
    %12 = vector.broadcast %11 : vector<1x128xf32> to vector<64x128xf32>
    %13 = arith.addf %10, %12 : vector<64x128xf32>
    %cst_11 = arith.constant 0.00999999977 : f32
    %14 = vector.broadcast %cst_11 : f32 to vector<64x128xf32>
    %15 = arith.mulf %14, %13 : vector<64x128xf32>
    %16 = arith.maximumf %13, %15 : vector<64x128xf32>
    %c0_12 = arith.constant 0 : index
    %c0_13 = arith.constant 0 : index
    %17 = vector.load %arg6[%c0_12, %c0_13] : memref<128x128xf32, #tpu.memory_space<vmem>>, vector<128x128xf32>
    %cst_14 = arith.constant dense<0.000000e+00> : vector<64x128xf32>
    %18 = tpu.matmul %16, %17, %cst_14 {dimension_numbers = #tpu.dot_dimension_numbers<[1], [0], [0], [1], [0, 0, 1, 1], [], []>} : vector<64x128xf32>, vector<128x128xf32>, vector<64x128xf32> -> vector<64x128xf32>
    %c0_15 = arith.constant 0 : index
    %c0_16 = arith.constant 0 : index
    %19 = vector.load %arg7[%c0_15, %c0_16] : memref<1x128xf32, #tpu.memory_space<vmem>>, vector<1x128xf32>
    %20 = vector.broadcast %19 : vector<1x128xf32> to vector<64x128xf32>
    %21 = arith.addf %18, %20 : vector<64x128xf32>
    %c0_17 = arith.constant 0 : index
    %c0_18 = arith.constant 0 : index
    %22 = vector.load %arg8[%c0_17, %c0_18] : memref<64x128xf32, #tpu.memory_space<vmem>>, vector<64x128xf32>
    tpu.vector_store %arg8[%c0_17, %c0_18], %21 {strides = array<i32>} : memref<64x128xf32, #tpu.memory_space<vmem>>, vector<64x128xf32>,
    return
  }
  func.func @transform_0(%arg0: i32) -> (i32, i32) {
    %c0_i32 = arith.constant 0 : i32
    %c0_i32_0 = arith.constant 0 : i32
    return %arg0, %c0_i32 : i32, i32
  }
  func.func @transform_1(%arg0: i32) -> (i32, i32) {
    %c0_i32 = arith.constant 0 : i32
    %c0_i32_0 = arith.constant 0 : i32
    %c0_i32_1 = arith.constant 0 : i32
    return %c0_i32, %c0_i32_0 : i32, i32
  }
  func.func @transform_2(%arg0: i32) -> (i32, i32) {
    %c0_i32 = arith.constant 0 : i32
    %c0_i32_0 = arith.constant 0 : i32
    %c0_i32_1 = arith.constant 0 : i32
    return %c0_i32, %c0_i32_0 : i32, i32
  }
  func.func @transform_3(%arg0: i32) -> (i32, i32) {
    %c0_i32 = arith.constant 0 : i32
    %c0_i32_0 = arith.constant 0 : i32
    %c0_i32_1 = arith.constant 0 : i32
    return %c0_i32, %c0_i32_0 : i32, i32
  }
  func.func @transform_4(%arg0: i32) -> (i32, i32) {
    %c0_i32 = arith.constant 0 : i32
    %c0_i32_0 = arith.constant 0 : i32
    %c0_i32_1 = arith.constant 0 : i32
    return %c0_i32, %c0_i32_0 : i32, i32
  }
  func.func @transform_5(%arg0: i32) -> (i32, i32) {
    %c0_i32 = arith.constant 0 : i32
    %c0_i32_0 = arith.constant 0 : i32
    %c0_i32_1 = arith.constant 0 : i32
    return %c0_i32, %c0_i32_0 : i32, i32
  }
  func.func @transform_6(%arg0: i32) -> (i32, i32) {
    %c0_i32 = arith.constant 0 : i32
    %c0_i32_0 = arith.constant 0 : i32
    %c0_i32_1 = arith.constant 0 : i32
    return %c0_i32, %c0_i32_0 : i32, i32
  }
  func.func @transform_7(%arg0: i32) -> (i32, i32) {
    %c0_i32 = arith.constant 0 : i32
    %c0_i32_0 = arith.constant 0 : i32
    return %arg0, %c0_i32 : i32, i32
  }
}

module attributes {stable_mosaic.version = 11 : i64} {
  func.func @_mlp_kernel(%arg0: i32, %arg1: memref<64x16xf32, #tpu.memory_space<vmem>>, %arg2: memref<16x128xf32, #tpu.memory_space<vmem>>, %arg3: memref<1x128xf32, #tpu.memory_space<vmem>>, %arg4: memref<128x128xf32, #tpu.memory_space<vmem>>, %arg5: memref<1x128xf32, #tpu.memory_space<vmem>>, %arg6: memref<128x128xf32, #tpu.memory_space<vmem>>, %arg7: memref<1x128xf32, #tpu.memory_space<vmem>>, %arg8: memref<64x128xf32, #tpu.memory_space<vmem>>) attributes {dimension_semantics = [#tpu.dimension_semantics<parallel>], iteration_bounds = array<i64: 1>, scalar_prefetch = 0 : i64, scratch_operands = 0 : i64, tpu.core_type = #tpu.core_type<tc>, window_params = [{transform_indices = @transform_0, window_bounds = array<i64: 64, 16>}, {pipeline_mode = #tpu.pipeline_mode<synchronous>, transform_indices = @transform_1, window_bounds = array<i64: 16, 128>}, {pipeline_mode = #tpu.pipeline_mode<synchronous>, transform_indices = @transform_2, window_bounds = array<i64: 1, 128>}, {pipeline_mode = #tpu.pipeline_mode<synchronous>, transform_indices = @transform_3, window_bounds = array<i64: 128, 128>}, {pipeline_mode = #tpu.pipeline_mode<synchronous>, transform_indices = @transform_4, window_bounds = array<i64: 1, 128>}, {pipeline_mode = #tpu.pipeline_mode<synchronous>, transform_indices = @transform_5, window_bounds = array<i64: 128, 128>}, {pipeline_mode = #tpu.pipeline_mode<synchronous>, transform_indices = @transform_6, window_bounds = array<i64: 1, 128>}, {transform_indices = @transform_7, window_bounds = array<i64: 64, 128>}]} {
    %c0 = arith.constant 0 : index
    %c0_0 = arith.constant 0 : index
    %0 = vector.load %arg1[%c0, %c0_0] : memref<64x16xf32, #tpu.memory_space<vmem>>, vector<64x16xf32>
    %c0_1 = arith.constant 0 : index
    %c0_2 = arith.constant 0 : index
    %1 = vector.load %arg2[%c0_1, %c0_2] : memref<16x128xf32, #tpu.memory_space<vmem>>, vector<16x128xf32>
    %cst = arith.constant dense<0.000000e+00> : vector<64x128xf32>
    %2 = tpu.matmul %0, %1, %cst {dimension_numbers = #tpu.dot_dimension_numbers<[1], [0], [0], [1], [0, 0, 1, 1], [], []>} : vector<64x16xf32>, vector<16x128xf32>, vector<64x128xf32> -> vector<64x128xf32>
    %c0_3 = arith.constant 0 : index
    %c0_4 = arith.constant 0 : index
    %3 = vector.load %arg3[%c0_3, %c0_4] : memref<1x128xf32, #tpu.memory_space<vmem>>, vector<1x128xf32>
    %4 = vector.broadcast %3 : vector<1x128xf32> to vector<64x128xf32>
    %5 = arith.addf %2, %4 : vector<64x128xf32>
    %cst_5 = arith.constant 0.00999999977 : f32
    %6 = vector.broadcast %cst_5 : f32 to vector<64x128xf32>
    %7 = arith.mulf %6, %5 : vector<64x128xf32>
    %8 = arith.maximumf %5, %7 : vector<64x128xf32>
    %c0_6 = arith.constant 0 : index
    %c0_7 = arith.constant 0 : index
    %9 = vector.load %arg4[%c0_6, %c0_7] : memref<128x128xf32, #tpu.memory_space<vmem>>, vector<128x128xf32>
    %cst_8 = arith.constant dense<0.000000e+00> : vector<64x128xf32>
    %10 = tpu.matmul %8, %9, %cst_8 {dimension_numbers = #tpu.dot_dimension_numbers<[1], [0], [0], [1], [0, 0, 1, 1], [], []>} : vector<64x128xf32>, vector<128x128xf32>, vector<64x128xf32> -> vector<64x128xf32>
    %c0_9 = arith.constant 0 : index
    %c0_10 = arith.constant 0 : index
    %11 = vector.load %arg5[%c0_9, %c0_10] : memref<1x128xf32, #tpu.memory_space<vmem>>, vector<1x128xf32>
    %12 = vector.broadcast %11 : vector<1x128xf32> to vector<64x128xf32>
    %13 = arith.addf %10, %12 : vector<64x128xf32>
    %cst_11 = arith.constant 0.00999999977 : f32
    %14 = vector.broadcast %cst_11 : f32 to vector<64x128xf32>
    %15 = arith.mulf %14, %13 : vector<64x128xf32>
    %16 = arith.maximumf %13, %15 : vector<64x128xf32>
    %c0_12 = arith.constant 0 : index
    %c0_13 = arith.constant 0 : index
    %17 = vector.load %arg6[%c0_12, %c0_13] : memref<128x128xf32, #tpu.memory_space<vmem>>, vector<128x128xf32>
    %cst_14 = arith.constant dense<0.000000e+00> : vector<64x128xf32>
    %18 = tpu.matmul %16, %17, %cst_14 {dimension_numbers = #tpu.dot_dimension_numbers<[1], [0], [0], [1], [0, 0, 1, 1], [], []>} : vector<64x128xf32>, vector<128x128xf32>, vector<64x128xf32> -> vector<64x128xf32>
    %c0_15 = arith.constant 0 : index
    %c0_16 = arith.constant 0 : index
    %19 = vector.load %arg7[%c0_15, %c0_16] : memref<1x128xf32, #tpu.memory_space<vmem>>, vector<1x128xf32>
    %20 = vector.broadcast %19 : vector<1x128xf32> to vector<64x128xf32>
    %21 = arith.addf %18, %20 : vector<64x128xf32>
    %c0_17 = arith.constant 0 : index
    %c0_18 = arith.constant 0 : index
    %22 = vector.load %arg8[%c0_17, %c0_18] : memref<64x128xf32, #tpu.memory_space<vmem>>, vector<64x128xf32>
    tpu.vector_store %arg8[%c0_17, %c0_18], %21 {strides = array<i32>} : memref<64x128xf32, #tpu.memory_space<vmem>>, vector<64x128xf32>,
    return
  }
  func.func @transform_0(%arg0: i32) -> (i32, i32) {
    %c0_i32 = arith.constant 0 : i32
    %c0_i32_0 = arith.constant 0 : i32
    return %arg0, %c0_i32 : i32, i32
  }
  func.func @transform_1(%arg0: i32) -> (i32, i32) {
    %c0_i32 = arith.constant 0 : i32
    %c0_i32_0 = arith.constant 0 : i32
    %c0_i32_1 = arith.constant 0 : i32
    return %c0_i32, %c0_i32_0 : i32, i32
  }
  func.func @transform_2(%arg0: i32) -> (i32, i32) {
    %c0_i32 = arith.constant 0 : i32
    %c0_i32_0 = arith.constant 0 : i32
    %c0_i32_1 = arith.constant 0 : i32
    return %c0_i32, %c0_i32_0 : i32, i32
  }
  func.func @transform_3(%arg0: i32) -> (i32, i32) {
    %c0_i32 = arith.constant 0 : i32
    %c0_i32_0 = arith.constant 0 : i32
    %c0_i32_1 = arith.constant 0 : i32
    return %c0_i32, %c0_i32_0 : i32, i32
  }
  func.func @transform_4(%arg0: i32) -> (i32, i32) {
    %c0_i32 = arith.constant 0 : i32
    %c0_i32_0 = arith.constant 0 : i32
    %c0_i32_1 = arith.constant 0 : i32
    return %c0_i32, %c0_i32_0 : i32, i32
  }
  func.func @transform_5(%arg0: i32) -> (i32, i32) {
    %c0_i32 = arith.constant 0 : i32
    %c0_i32_0 = arith.constant 0 : i32
    %c0_i32_1 = arith.constant 0 : i32
    return %c0_i32, %c0_i32_0 : i32, i32
  }
  func.func @transform_6(%arg0: i32) -> (i32, i32) {
    %c0_i32 = arith.constant 0 : i32
    %c0_i32_0 = arith.constant 0 : i32
    %c0_i32_1 = arith.constant 0 : i32
    return %c0_i32, %c0_i32_0 : i32, i32
  }
  func.func @transform_7(%arg0: i32) -> (i32, i32) {
    %c0_i32 = arith.constant 0 : i32
    %c0_i32_0 = arith.constant 0 : i32
    return %arg0, %c0_i32 : i32, i32
  }
}

</mosaic_0001>

<bundles_post_ra>
// kernel: tpu_custom_call.1
= control target key start
LH: loop header
LB: loop body
LE: loop exit
PB: predicated region body
PF: predicated region fallthrough
CT: control target
= control target key end

     0   :  { %12 = vsyncpa [#allocation3], 0  ;;  %s971_s0 = inlined_call_operand.vmem [shape: f32[64,16], index: 0, kind: input, shape index: {}]   ;;  %s972_s1 = inlined_call_operand.vmem [shape: f32[16,128], index: 1, kind: input, shape index: {}]   ;;  %s973_s2 = inlined_call_operand.vmem [shape: f32[1,128], index: 2, kind: input, shape index: {}]   ;;  %s974_s3 = inlined_call_operand.hbm [shape: f32[128,128], index: 3, kind: input, shape index: {}]   ;;  %s975_s4 = inlined_call_operand.vmem [shape: f32[1,128], index: 4, kind: input, shape index: {}]   ;;  %s976_s5 = inlined_call_operand.hbm [shape: f32[128,128], index: 5, kind: input, shape index: {}]   ;;  %s977_s6 = inlined_call_operand.vmem [shape: f32[1,128], index: 6, kind: input, shape index: {}]   ;;  %s978_s7 = inlined_call_operand.hbm [shape: f32[64,128], index: 7, kind: output, shape index: {}]  }
   0x1   :  { %13 = vsyncpa [#allocation6], 0 }
   0x2   :  { %14 = vsyncpa [#allocation4], 0  ;;  %s834_s24 = smov [#allocation2]   ;;  %s762_s28 = scalar_lea.hbm %s974_s3, 2048 }
   0x3   :  { %s26_s25 = sshll.u32 %s834_s24, 4  ;;  %p763_p0 = scmp.ne.s32.totalorder %s974_s3, %s762_s28  ;;  %s27_s25 = int_to_ptr.vmem [resolvable:$true] %s26_s25 }
   0x4   :  { %p766_p1 = scmp.lt.u32.totalorder %s762_s28, %s974_s3 }
   0x6   :  { %p768_p2 = pnand %p766_p1, %p763_p0 }
   0x8   :  { %771 = shalt.err (!%p768_p2)
}
   0x9   :  { %s772_s10 = scalar_lea.vmem %s27_s25, 2048  ;;  %p777_p4 = scmp.lt.s32.totalorder %s27_s25, %s27_s25 }
   0xa   :  { %p773_p3 = scmp.ne.s32.totalorder %s27_s25, %s772_s10  ;;  %p778_p5 = scmp.lt.s32.totalorder %s772_s10, %s772_s10 }
   0xc   :  { %p779_p6 = por %p778_p5, %p777_p4 }
   0xe   :  { %p780_p7 = pnand %p779_p6, %p773_p3 }
  0x10   :  { %783 = shalt.err (!%p780_p7)
}
  0x11   :  { %s835_s11 = smov 128   ;;  %s836_s12 = smov 8  }
  0x12   :  { %32 = dma.hbm_to_vmem [thread:$0]  %s974_s3, 2048, %s27_s25, [#allocation3], %s835_s11, %s835_s11, %s836_s12  }
  0x13   :  { %s837_s15 = smov [#allocation5]   ;;  %s784_s19 = scalar_lea.hbm %s976_s5, 2048 }
  0x14   :  { %s40_s16 = sshll.u32 %s837_s15, 4  ;;  %p785_p8 = scmp.ne.s32.totalorder %s976_s5, %s784_s19  ;;  %s41_s16 = int_to_ptr.vmem [resolvable:$true] %s40_s16 }
  0x15   :  { %p788_p9 = scmp.lt.u32.totalorder %s784_s19, %s976_s5 }
  0x17   :  { %p790_p10 = pnand %p788_p9, %p785_p8 }
  0x19   :  { %793 = shalt.err (!%p790_p10)
}
  0x1a   :  { %s794_s24 = scalar_lea.vmem %s41_s16, 2048  ;;  %p799_p12 = scmp.lt.s32.totalorder %s41_s16, %s41_s16 }
  0x1b   :  { %p795_p11 = scmp.ne.s32.totalorder %s41_s16, %s794_s24  ;;  %p800_p13 = scmp.lt.s32.totalorder %s794_s24, %s794_s24 }
  0x1d   :  { %p801_p0 = por %p800_p13, %p799_p12 }
  0x1f   :  { %p802_p1 = pnand %p801_p0, %p795_p11 }
  0x21   :  { %805 = shalt.err (!%p802_p1)
}
  0x22   :  { %46 = dma.hbm_to_vmem [thread:$0]  %s976_s5, 2048, %s41_s16, [#allocation6], %s835_s11, %s835_s11, %s836_s12  }
  0x23   :  { %828 = dma.done.wait [#allocation3], 2048  }
  0x24   :  { %829 = vsyncadd [#allocation3], 4294965248 }
  0x25   :  { %830 = dma.done.wait [#allocation6], 2048  }
  0x26   :  { %831 = vsyncadd [#allocation6], 4294965248  ;;  %vm72_vm0 = vcmask 130048   ;;  %v63_v0 = vld [vmem:[%s972_s1] sm:$0xff]  ;;  %v64_v1 = vld [vmem:[%s972_s1 + $0x8] sm:$0xff]  ;;  %s838_s25 = smov [#allocation7]  }
  0x27   :  { %v55_v2 = vld [vmem:[%s971_s0] sm:$0xff]  ;;  %v689_v3 = vpack.c.bf16 %v64_v1, %v63_v0  ;;  %v219_v5 = vld [vmem:[#allocation2 + $0x8] sm:$0xff]  ;;  %v220_v8 = vld [vmem:[#allocation2 + $0x10] sm:$0xff]  ;;  %s503_s26 = sshll.u32 %s838_s25, 4  ;;  %s504_s26 = int_to_ptr.vmem [resolvable:$true] %s503_s26 }
  0x28   :  { %589 = vmatprep.mubr.msk.f32.mxu0 %vm72_vm0, %v55_v2  ;;  %v218_v4 = vld [vmem:[#allocation2] sm:$0xff]  ;;  %v56_v6 = vld [vmem:[%s971_s0 + $0x8] sm:$0xff]  ;;  %v221_v9 = vld [vmem:[#allocation2 + $0x18] sm:$0xff]  ;;  %p811_p3 = scmp.lt.s32.totalorder %s504_s26, %s504_s26 }
  0x29   :  { %690 = vmatprep.subr.bf16.mxu0 %v689_v3  ;;  %v693_v7 = vpack.c.bf16 %v219_v5, %v218_v4  ;;  %v57_v10 = vld [vmem:[%s971_s0 + $0x10] sm:$0xff]  ;;  %v697_v11 = vpack.c.bf16 %v221_v9, %v220_v8  ;;  %v222_v12 = vld [vmem:[#allocation2 + $0x20] sm:$0xff]  ;;  %v223_v13 = vld [vmem:[#allocation2 + $0x28] sm:$0xff] }
  0x2a   :  { %692 = vmatpush3.bf16.msra.mxu0 %v689_v3  ;;  %v58_v14 = vld [vmem:[%s971_s0 + $0x18] sm:$0xff]  ;;  %v701_v15 = vpack.c.bf16 %v223_v13, %v222_v12  ;;  %v59_v16 = vld [vmem:[%s971_s0 + $0x20] sm:$0xff]  ;;  %v224_v17 = vld [vmem:[#allocation2 + $0x30] sm:$0xff] }
  0x2b   :  { %694 = vmatprep.subr.bf16.mxu1 %v693_v7  ;;  %v225_v18 = vld [vmem:[#allocation2 + $0x38] sm:$0xff]  ;;  %v60_v19 = vld [vmem:[%s971_s0 + $0x28] sm:$0xff]  ;;  %v61_v21 = vld [vmem:[%s971_s0 + $0x30] sm:$0xff] }
  0x2c   :  { %696 = vmatpush3.bf16.msra.mxu1 %v693_v7  ;;  %v705_v20 = vpack.c.bf16 %v225_v18, %v224_v17  ;;  %v226_v22 = vld [vmem:[#allocation2 + $0x40] sm:$0xff]  ;;  %v227_v23 = vld [vmem:[#allocation2 + $0x48] sm:$0xff]  ;;  %v62_v24 = vld [vmem:[%s971_s0 + $0x38] sm:$0xff] }
  0x2d   :  { %590 = vmatmul.mubr.msk.f32.vlgmr.msra.gmra.mrb[0].mxu0 %vm72_vm0, %v56_v6  ;;  %698 = vmatprep.subr.bf16.mxu1 %v697_v11  ;;  %v709_v25 = vpack.c.bf16 %v227_v23, %v226_v22  ;;  %v228_v26 = vld [vmem:[#allocation2 + $0x50] sm:$0xff]  ;;  %v229_v27 = vld [vmem:[#allocation2 + $0x58] sm:$0xff]  ;;  %v230_v29 = vld [vmem:[#allocation2 + $0x60] sm:$0xff] }
  0x2e   :  { %592 = vmatprep.mubr.msk.f32.mxu0 %vm72_vm0, %v57_v10  ;;  %v713_v28 = vpack.c.bf16 %v229_v27, %v228_v26  ;;  %v231_v30 = vld [vmem:[#allocation2 + $0x68] sm:$0xff]  ;;  %v232_v32 = vld [vmem:[#allocation2 + $0x70] sm:$0xff]  ;;  %v233_v33 = vld [vmem:[#allocation2 + $0x78] sm:$0xff] }
  0x2f   :  { %v717_v31 = vpack.c.bf16 %v231_v30, %v230_v29  ;;  %v721_v34 = vpack.c.bf16 %v233_v33, %v232_v32  ;;  %v362_v35 = vld [vmem:[#allocation5] sm:$0xff]  ;;  %v363_v36 = vld [vmem:[#allocation5 + $0x8] sm:$0xff]  ;;  %v364_v37 = vld [vmem:[#allocation5 + $0x10] sm:$0xff] }
  0x30   :  { %700 = vmatpush3.bf16.msra.mxu1 %v697_v11  ;;  %v725_v38 = vpack.c.bf16 %v363_v36, %v362_v35  ;;  %v365_v39 = vld [vmem:[#allocation5 + $0x18] sm:$0xff]  ;;  %v366_v41 = vld [vmem:[#allocation5 + $0x20] sm:$0xff]  ;;  %v367_v42 = vld [vmem:[#allocation5 + $0x28] sm:$0xff] }
  0x31   :  { %593 = vmatmul.mubr.msk.f32.gmra.mrb[2].mxu0 %vm72_vm0, %v58_v14  ;;  %702 = vmatprep.subr.bf16.mxu1 %v701_v15  ;;  %v729_v40 = vpack.c.bf16 %v365_v39, %v364_v37  ;;  %v733_v43 = vpack.c.bf16 %v367_v42, %v366_v41  ;;  %v368_v44 = vld [vmem:[#allocation5 + $0x30] sm:$0xff]  ;;  %v369_v45 = vld [vmem:[#allocation5 + $0x38] sm:$0xff]  ;;  %v370_v47 = vld [vmem:[#allocation5 + $0x40] sm:$0xff] }
  0x32   :  { %595 = vmatprep.mubr.msk.f32.mxu0 %vm72_vm0, %v59_v16  ;;  %726 = vmatprep.subr.bf16.mxu0 %v725_v38  ;;  %v737_v46 = vpack.c.bf16 %v369_v45, %v368_v44  ;;  %v371_v48 = vld [vmem:[#allocation5 + $0x48] sm:$0xff]  ;;  %v372_v50 = vld [vmem:[#allocation5 + $0x50] sm:$0xff]  ;;  %v373_v51 = vld [vmem:[#allocation5 + $0x58] sm:$0xff] }
  0x33   :  { %728 = vmatpush3.bf16.msra.mxu0 %v725_v38  ;;  %v741_v49 = vpack.c.bf16 %v371_v48, %v370_v47  ;;  %v745_v52 = vpack.c.bf16 %v373_v51, %v372_v50  ;;  %v516_v53 = vld [vmem:[%s973_s2] ss:$0 sm:$0xff]  ;;  %v375_v23 = vld [vmem:[#allocation5 + $0x68] sm:$0xff]  ;;  %v377_v26 = vld [vmem:[#allocation5 + $0x78] sm:$0xff] }
  0x34   :  { %704 = vmatpush3.bf16.msra.mxu1 %v701_v15  ;;  %730 = vmatprep.subr.bf16.mxu0 %v729_v40  ;;  %v374_v22 = vld [vmem:[#allocation5 + $0x60] sm:$0xff] }
  0x35   :  { %596 = vmatmul.mubr.msk.f32.gmra.mrb[4].mxu0 %vm72_vm0, %v60_v19  ;;  %706 = vmatprep.subr.bf16.mxu1 %v705_v20 }
  0x36   :  { %598 = vmatprep.mubr.msk.f32.mxu0 %vm72_vm0, %v61_v21 }
  0x37   :  { %732 = vmatpush3.bf16.msra.mxu0 %v729_v40 }
  0x38   :  { %708 = vmatpush3.bf16.msra.mxu1 %v705_v20  ;;  %734 = vmatprep.subr.bf16.mxu0 %v733_v43 }
  0x39   :  { %599 = vmatmul.mubr.msk.f32.gmra.mrb[6].mxu0 %vm72_vm0, %v62_v24  ;;  %710 = vmatprep.subr.bf16.mxu1 %v709_v25  ;;  %v749_v24 = vpack.c.bf16 %v375_v23, %v374_v22 }
  0x3b   :  { %736 = vmatpush3.bf16.msra.mxu0 %v733_v43 }
  0x3c   :  { %712 = vmatpush3.bf16.msra.mxu1 %v709_v25  ;;  %738 = vmatprep.subr.bf16.mxu0 %v737_v46  ;;  %v376_v25 = vld [vmem:[#allocation5 + $0x70] sm:$0xff] }
  0x3d   :  { %714 = vmatprep.subr.bf16.mxu1 %v713_v28  ;;  %v753_v27 = vpack.c.bf16 %v377_v26, %v376_v25 }
  0x3f   :  { %740 = vmatpush3.bf16.msra.mxu0 %v737_v46 }
  0x40   :  { %716 = vmatpush3.bf16.msra.mxu1 %v713_v28  ;;  %742 = vmatprep.subr.bf16.mxu0 %v741_v49  ;;  %v525_v28 = vld [vmem:[%s975_s4] ss:$0 sm:$0xff] }
  0x41   :  { %718 = vmatprep.subr.bf16.mxu1 %v717_v31 }
  0x43   :  { %744 = vmatpush3.bf16.msra.mxu0 %v741_v49 }
  0x44   :  { %720 = vmatpush3.bf16.msra.mxu1 %v717_v31  ;;  %746 = vmatprep.subr.bf16.mxu0 %v745_v52 }
  0x45   :  { %722 = vmatprep.subr.bf16.mxu1 %v721_v34 }
  0x47   :  { %748 = vmatpush3.bf16.msra.mxu0 %v745_v52 }
  0x48   :  { %724 = vmatpush3.bf16.msra.mxu1 %v721_v34  ;;  %750 = vmatprep.subr.bf16.mxu0 %v749_v24 }
  0x4b   :  { %752 = vmatpush3.bf16.msra.mxu0 %v749_v24 }
  0x4c   :  { %754 = vmatprep.subr.bf16.mxu0 %v753_v27 }
  0x4f   :  { %756 = vmatpush3.bf16.msra.mxu0 %v753_v27 }
 0x100   :  { %v591_v54 = vpop.f32.mrb[0].mxu0 }
 0x101   :  { %v169_v55 = vadd.f32 %v591_v54, %v516_v53  ;;  %v163_v56 = vpop.f32.mrb[1].mxu0 }
 0x102   :  { %v164_v57 = vadd.f32 %v516_v53, %v163_v56 }
 0x103   :  { %v203_v58 = vmul.f32 0.01, %v169_v55 }
 0x104   :  { %v594_v59 = vpop.f32.mrb[2].mxu0  ;;  %v202_v60 = vmul.f32 0.01, %v164_v57 }
 0x105   :  { %v179_v61 = vadd.f32 %v594_v59, %v516_v53  ;;  %v173_v62 = vpop.f32.mrb[3].mxu0  ;;  %v211_v1 = vmax.f32 %v169_v55, %v203_v58 }
 0x106   :  { %v174_v63 = vadd.f32 %v516_v53, %v173_v62  ;;  %v210_v0 = vmax.f32 %v164_v57, %v202_v60 }
 0x107   :  { %v205_v2 = vmul.f32 0.01, %v179_v61 }
 0x108   :  { %v204_v3 = vmul.f32 0.01, %v174_v63  ;;  %v597_v4 = vpop.f32.mrb[4].mxu0  ;;  %633 = vmatprep.mubr.f32.mxu1 %v210_v0 }
 0x109   :  { %v189_v5 = vadd.f32 %v597_v4, %v516_v53  ;;  %v183_v6 = vpop.f32.mrb[5].mxu0  ;;  %634 = vmatmul.mubr.f32.vlgmr.msra.gmra.mrb[0].mxu1 %v211_v1  ;;  %v213_v9 = vmax.f32 %v179_v61, %v205_v2  ;;  %v526_v61 = vld [vmem:[%s977_s6] ss:$0 sm:$0xff]  ;;  %s806_s6 = scalar_lea.vmem %s504_s26, 1024 }
 0x10a   :  { %v212_v7 = vmax.f32 %v174_v63, %v204_v3  ;;  %v184_v8 = vadd.f32 %v516_v53, %v183_v6  ;;  %p807_p2 = scmp.ne.s32.totalorder %s504_s26, %s806_s6  ;;  %p812_p4 = scmp.lt.s32.totalorder %s806_s6, %s806_s6 }
 0x10b   :  { %v207_v10 = vmul.f32 0.01, %v189_v5 }
 0x10c   :  { %v206_v11 = vmul.f32 0.01, %v184_v8  ;;  %v600_v12 = vpop.f32.mrb[6].mxu0  ;;  %636 = vmatprep.mubr.f32.mxu1 %v212_v7  ;;  %p813_p5 = por %p812_p4, %p811_p3 }
 0x10d   :  { %v199_v13 = vadd.f32 %v600_v12, %v516_v53  ;;  %v193_v14 = vpop.f32.mrb[7].mxu0  ;;  %637 = vmatmul.mubr.f32.gmra.mrb[2].mxu1 %v213_v9  ;;  %v215_v17 = vmax.f32 %v189_v5, %v207_v10 }
 0x10e   :  { %v214_v15 = vmax.f32 %v184_v8, %v206_v11  ;;  %v194_v16 = vadd.f32 %v516_v53, %v193_v14  ;;  %p814_p6 = pnand %p813_p5, %p807_p2 }
 0x10f   :  { %v209_v18 = vmul.f32 0.01, %v199_v13 }
 0x110   :  { %v208_v19 = vmul.f32 0.01, %v194_v16  ;;  %639 = vmatprep.mubr.f32.mxu1 %v214_v15 }
 0x111   :  { %640 = vmatmul.mubr.f32.gmra.mrb[4].mxu1 %v215_v17  ;;  %v217_v21 = vmax.f32 %v199_v13, %v209_v18 }
 0x112   :  { %v216_v20 = vmax.f32 %v194_v16, %v208_v19 }
 0x114   :  { %642 = vmatprep.mubr.f32.mxu1 %v216_v20 }
 0x115   :  { %643 = vmatmul.mubr.f32.gmra.mrb[6].mxu1 %v217_v21 }
 0x1dc   :  { %v635_v29 = vpop.f32.mrb[0].mxu1 }
 0x1dd   :  { %v313_v30 = vadd.f32 %v635_v29, %v525_v28  ;;  %v307_v31 = vpop.f32.mrb[1].mxu1 }
 0x1de   :  { %v308_v32 = vadd.f32 %v525_v28, %v307_v31 }
 0x1df   :  { %v347_v33 = vmul.f32 0.01, %v313_v30 }
 0x1e0   :  { %v346_v34 = vmul.f32 0.01, %v308_v32  ;;  %v638_v35 = vpop.f32.mrb[2].mxu1 }
 0x1e1   :  { %v323_v36 = vadd.f32 %v638_v35, %v525_v28  ;;  %v317_v37 = vpop.f32.mrb[3].mxu1  ;;  %v355_v40 = vmax.f32 %v313_v30, %v347_v33 }
 0x1e2   :  { %v354_v38 = vmax.f32 %v308_v32, %v346_v34  ;;  %v318_v39 = vadd.f32 %v525_v28, %v317_v37 }
 0x1e3   :  { %v349_v41 = vmul.f32 0.01, %v323_v36 }
 0x1e4   :  { %v348_v42 = vmul.f32 0.01, %v318_v39  ;;  %v641_v43 = vpop.f32.mrb[4].mxu1  ;;  %677 = vmatprep.mubr.f32.mxu0 %v354_v38 }
 0x1e5   :  { %v333_v44 = vadd.f32 %v641_v43, %v525_v28  ;;  %v327_v45 = vpop.f32.mrb[5].mxu1  ;;  %678 = vmatmul.mubr.f32.vlgmr.msra.gmra.mrb[8].mxu0 %v355_v40  ;;  %v357_v48 = vmax.f32 %v323_v36, %v349_v41 }
 0x1e6   :  { %v356_v46 = vmax.f32 %v318_v39, %v348_v42  ;;  %v328_v47 = vadd.f32 %v525_v28, %v327_v45 }
 0x1e7   :  { %v351_v49 = vmul.f32 0.01, %v333_v44 }
 0x1e8   :  { %v350_v50 = vmul.f32 0.01, %v328_v47  ;;  %v644_v51 = vpop.f32.mrb[6].mxu1  ;;  %680 = vmatprep.mubr.f32.mxu0 %v356_v46 }
 0x1e9   :  { %v343_v52 = vadd.f32 %v644_v51, %v525_v28  ;;  %v337_v53 = vpop.f32.mrb[7].mxu1  ;;  %681 = vmatmul.mubr.f32.gmra.mrb[10].mxu0 %v357_v48  ;;  %v359_v56 = vmax.f32 %v333_v44, %v351_v49 }
 0x1ea   :  { %v358_v54 = vmax.f32 %v328_v47, %v350_v50  ;;  %v338_v55 = vadd.f32 %v525_v28, %v337_v53 }
 0x1eb   :  { %v353_v57 = vmul.f32 0.01, %v343_v52 }
 0x1ec   :  { %v352_v58 = vmul.f32 0.01, %v338_v55  ;;  %683 = vmatprep.mubr.f32.mxu0 %v358_v54 }
 0x1ed   :  { %684 = vmatmul.mubr.f32.gmra.mrb[12].mxu0 %v359_v56  ;;  %v361_v60 = vmax.f32 %v343_v52, %v353_v57 }
 0x1ee   :  { %v360_v59 = vmax.f32 %v338_v55, %v352_v58 }
 0x1f0   :  { %686 = vmatprep.mubr.f32.mxu0 %v360_v59 }
 0x1f1   :  { %687 = vmatmul.mubr.f32.gmra.mrb[14].mxu0 %v361_v60 }
 0x2b8   :  { %v679_v62 = vpop.f32.mrb[8].mxu0 }
 0x2b9   :  { %v457_v63 = vadd.f32 %v679_v62, %v526_v61  ;;  %v451_v0 = vpop.f32.mrb[9].mxu0 }
 0x2ba   :  { %v452_v1 = vadd.f32 %v526_v61, %v451_v0 }
 0x2bb   :  { %491 = vst [vmem:[#allocation7 + $0x8] sm:$0xff] %v457_v63 }
 0x2bc   :  { %490 = vst [vmem:[#allocation7] sm:$0xff] %v452_v1  ;;  %v682_v2 = vpop.f32.mrb[10].mxu0 }
 0x2bd   :  { %v467_v3 = vadd.f32 %v682_v2, %v526_v61  ;;  %v461_v4 = vpop.f32.mrb[11].mxu0 }
 0x2be   :  { %v462_v5 = vadd.f32 %v526_v61, %v461_v4 }
 0x2bf   :  { %493 = vst [vmem:[#allocation7 + $0x18] sm:$0xff] %v467_v3 }
 0x2c0   :  { %492 = vst [vmem:[#allocation7 + $0x10] sm:$0xff] %v462_v5  ;;  %v685_v6 = vpop.f32.mrb[12].mxu0 }
 0x2c1   :  { %v477_v7 = vadd.f32 %v685_v6, %v526_v61  ;;  %v471_v8 = vpop.f32.mrb[13].mxu0 }
 0x2c2   :  { %v472_v9 = vadd.f32 %v526_v61, %v471_v8 }
 0x2c3   :  { %495 = vst [vmem:[#allocation7 + $0x28] sm:$0xff] %v477_v7 }
 0x2c4   :  { %494 = vst [vmem:[#allocation7 + $0x20] sm:$0xff] %v472_v9  ;;  %v688_v10 = vpop.f32.mrb[14].mxu0 }
 0x2c5   :  { %v487_v11 = vadd.f32 %v688_v10, %v526_v61  ;;  %v481_v12 = vpop.f32.mrb[15].mxu0 }
 0x2c6   :  { %v482_v13 = vadd.f32 %v526_v61, %v481_v12 }
 0x2c7   :  { %497 = vst [vmem:[#allocation7 + $0x38] sm:$0xff] %v487_v11 }
 0x2c8   :  { %496 = vst [vmem:[#allocation7 + $0x30] sm:$0xff] %v482_v13 }
 0x2c9   :  { %817 = shalt.err (!%p814_p6)
}
 0x2ca   :  { %s818_s29 = scalar_lea.hbm %s978_s7, 1024 }
 0x2cb   :  { %p819_p7 = scmp.ne.s32.totalorder %s978_s7, %s818_s29  ;;  %p822_p8 = scmp.lt.u32.totalorder %s818_s29, %s978_s7 }
 0x2cd   :  { %p824_p9 = pnand %p822_p8, %p819_p7 }
 0x2cf   :  { %827 = shalt.err (!%p824_p9)
}
 0x2d0   :  { %509 = dma.vmem_to_hbm [thread:$0]  %s504_s26, 1024, %s978_s7, [#allocation4], %s835_s11, %s835_s11, %s836_s12  }
 0x2d1   :  { %832 = dma.done.wait [#allocation4], 1024  }
 0x2d2   :  { %833 = vsyncadd [#allocation4], 4294966272 }
 0x2d3   :  { %513 = vsyncpa [#allocation3], 1 }
 0x2d4   :  { %514 = vsyncpa [#allocation6], 1 }
 0x2d5   :  { %515 = vsyncpa [#allocation4], 1 }

// kernel: tpu_custom_call.1
= control target key start
LH: loop header
LB: loop body
LE: loop exit
PB: predicated region body
PF: predicated region fallthrough
CT: control target
= control target key end

     0   :  { %12 = vsyncpa [#allocation3], 0  ;;  %s971_s0 = inlined_call_operand.vmem [shape: f32[64,16], index: 0, kind: input, shape index: {}]   ;;  %s972_s1 = inlined_call_operand.vmem [shape: f32[16,128], index: 1, kind: input, shape index: {}]   ;;  %s973_s2 = inlined_call_operand.vmem [shape: f32[1,128], index: 2, kind: input, shape index: {}]   ;;  %s974_s3 = inlined_call_operand.hbm [shape: f32[128,128], index: 3, kind: input, shape index: {}]   ;;  %s975_s4 = inlined_call_operand.vmem [shape: f32[1,128], index: 4, kind: input, shape index: {}]   ;;  %s976_s5 = inlined_call_operand.hbm [shape: f32[128,128], index: 5, kind: input, shape index: {}]   ;;  %s977_s6 = inlined_call_operand.vmem [shape: f32[1,128], index: 6, kind: input, shape index: {}]   ;;  %s978_s7 = inlined_call_operand.hbm [shape: f32[64,128], index: 7, kind: output, shape index: {}]  }
   0x1   :  { %13 = vsyncpa [#allocation6], 0 }
   0x2   :  { %14 = vsyncpa [#allocation4], 0  ;;  %s834_s24 = smov [#allocation2]   ;;  %s762_s28 = scalar_lea.hbm %s974_s3, 2048 }
   0x3   :  { %s26_s25 = sshll.u32 %s834_s24, 4  ;;  %p763_p0 = scmp.ne.s32.totalorder %s974_s3, %s762_s28  ;;  %s27_s25 = int_to_ptr.vmem [resolvable:$true] %s26_s25 }
   0x4   :  { %p766_p1 = scmp.lt.u32.totalorder %s762_s28, %s974_s3 }
   0x6   :  { %p768_p2 = pnand %p766_p1, %p763_p0 }
   0x8   :  { %771 = shalt.err (!%p768_p2)
}
   0x9   :  { %s772_s10 = scalar_lea.vmem %s27_s25, 2048  ;;  %p777_p4 = scmp.lt.s32.totalorder %s27_s25, %s27_s25 }
   0xa   :  { %p773_p3 = scmp.ne.s32.totalorder %s27_s25, %s772_s10  ;;  %p778_p5 = scmp.lt.s32.totalorder %s772_s10, %s772_s10 }
   0xc   :  { %p779_p6 = por %p778_p5, %p777_p4 }
   0xe   :  { %p780_p7 = pnand %p779_p6, %p773_p3 }
  0x10   :  { %783 = shalt.err (!%p780_p7)
}
  0x11   :  { %s835_s11 = smov 128   ;;  %s836_s12 = smov 8  }
  0x12   :  { %32 = dma.hbm_to_vmem [thread:$0]  %s974_s3, 2048, %s27_s25, [#allocation3], %s835_s11, %s835_s11, %s836_s12  }
  0x13   :  { %s837_s15 = smov [#allocation5]   ;;  %s784_s19 = scalar_lea.hbm %s976_s5, 2048 }
  0x14   :  { %s40_s16 = sshll.u32 %s837_s15, 4  ;;  %p785_p8 = scmp.ne.s32.totalorder %s976_s5, %s784_s19  ;;  %s41_s16 = int_to_ptr.vmem [resolvable:$true] %s40_s16 }
  0x15   :  { %p788_p9 = scmp.lt.u32.totalorder %s784_s19, %s976_s5 }
  0x17   :  { %p790_p10 = pnand %p788_p9, %p785_p8 }
  0x19   :  { %793 = shalt.err (!%p790_p10)
}
  0x1a   :  { %s794_s24 = scalar_lea.vmem %s41_s16, 2048  ;;  %p799_p12 = scmp.lt.s32.totalorder %s41_s16, %s41_s16 }
  0x1b   :  { %p795_p11 = scmp.ne.s32.totalorder %s41_s16, %s794_s24  ;;  %p800_p13 = scmp.lt.s32.totalorder %s794_s24, %s794_s24 }
  0x1d   :  { %p801_p0 = por %p800_p13, %p799_p12 }
  0x1f   :  { %p802_p1 = pnand %p801_p0, %p795_p11 }
  0x21   :  { %805 = shalt.err (!%p802_p1)
}
  0x22   :  { %46 = dma.hbm_to_vmem [thread:$0]  %s976_s5, 2048, %s41_s16, [#allocation6], %s835_s11, %s835_s11, %s836_s12  }
  0x23   :  { %828 = dma.done.wait [#allocation3], 2048  }
  0x24   :  { %829 = vsyncadd [#allocation3], 4294965248 }
  0x25   :  { %830 = dma.done.wait [#allocation6], 2048  }
  0x26   :  { %831 = vsyncadd [#allocation6], 4294965248  ;;  %vm72_vm0 = vcmask 130048   ;;  %v63_v0 = vld [vmem:[%s972_s1] sm:$0xff]  ;;  %v64_v1 = vld [vmem:[%s972_s1 + $0x8] sm:$0xff]  ;;  %s838_s25 = smov [#allocation7]  }
  0x27   :  { %v55_v2 = vld [vmem:[%s971_s0] sm:$0xff]  ;;  %v689_v3 = vpack.c.bf16 %v64_v1, %v63_v0  ;;  %v219_v5 = vld [vmem:[#allocation2 + $0x8] sm:$0xff]  ;;  %v220_v8 = vld [vmem:[#allocation2 + $0x10] sm:$0xff]  ;;  %s503_s26 = sshll.u32 %s838_s25, 4  ;;  %s504_s26 = int_to_ptr.vmem [resolvable:$true] %s503_s26 }
  0x28   :  { %589 = vmatprep.mubr.msk.f32.mxu0 %vm72_vm0, %v55_v2  ;;  %v218_v4 = vld [vmem:[#allocation2] sm:$0xff]  ;;  %v56_v6 = vld [vmem:[%s971_s0 + $0x8] sm:$0xff]  ;;  %v221_v9 = vld [vmem:[#allocation2 + $0x18] sm:$0xff]  ;;  %p811_p3 = scmp.lt.s32.totalorder %s504_s26, %s504_s26 }
  0x29   :  { %690 = vmatprep.subr.bf16.mxu0 %v689_v3  ;;  %v693_v7 = vpack.c.bf16 %v219_v5, %v218_v4  ;;  %v57_v10 = vld [vmem:[%s971_s0 + $0x10] sm:$0xff]  ;;  %v697_v11 = vpack.c.bf16 %v221_v9, %v220_v8  ;;  %v222_v12 = vld [vmem:[#allocation2 + $0x20] sm:$0xff]  ;;  %v223_v13 = vld [vmem:[#allocation2 + $0x28] sm:$0xff] }
  0x2a   :  { %692 = vmatpush3.bf16.msra.mxu0 %v689_v3  ;;  %v58_v14 = vld [vmem:[%s971_s0 + $0x18] sm:$0xff]  ;;  %v701_v15 = vpack.c.bf16 %v223_v13, %v222_v12  ;;  %v59_v16 = vld [vmem:[%s971_s0 + $0x20] sm:$0xff]  ;;  %v224_v17 = vld [vmem:[#allocation2 + $0x30] sm:$0xff] }
  0x2b   :  { %694 = vmatprep.subr.bf16.mxu1 %v693_v7  ;;  %v225_v18 = vld [vmem:[#allocation2 + $0x38] sm:$0xff]  ;;  %v60_v19 = vld [vmem:[%s971_s0 + $0x28] sm:$0xff]  ;;  %v61_v21 = vld [vmem:[%s971_s0 + $0x30] sm:$0xff] }
  0x2c   :  { %696 = vmatpush3.bf16.msra.mxu1 %v693_v7  ;;  %v705_v20 = vpack.c.bf16 %v225_v18, %v224_v17  ;;  %v226_v22 = vld [vmem:[#allocation2 + $0x40] sm:$0xff]  ;;  %v227_v23 = vld [vmem:[#allocation2 + $0x48] sm:$0xff]  ;;  %v62_v24 = vld [vmem:[%s971_s0 + $0x38] sm:$0xff] }
  0x2d   :  { %590 = vmatmul.mubr.msk.f32.vlgmr.msra.gmra.mrb[0].mxu0 %vm72_vm0, %v56_v6  ;;  %698 = vmatprep.subr.bf16.mxu1 %v697_v11  ;;  %v709_v25 = vpack.c.bf16 %v227_v23, %v226_v22  ;;  %v228_v26 = vld [vmem:[#allocation2 + $0x50] sm:$0xff]  ;;  %v229_v27 = vld [vmem:[#allocation2 + $0x58] sm:$0xff]  ;;  %v230_v29 = vld [vmem:[#allocation2 + $0x60] sm:$0xff] }
  0x2e   :  { %592 = vmatprep.mubr.msk.f32.mxu0 %vm72_vm0, %v57_v10  ;;  %v713_v28 = vpack.c.bf16 %v229_v27, %v228_v26  ;;  %v231_v30 = vld [vmem:[#allocation2 + $0x68] sm:$0xff]  ;;  %v232_v32 = vld [vmem:[#allocation2 + $0x70] sm:$0xff]  ;;  %v233_v33 = vld [vmem:[#allocation2 + $0x78] sm:$0xff] }
  0x2f   :  { %v717_v31 = vpack.c.bf16 %v231_v30, %v230_v29  ;;  %v721_v34 = vpack.c.bf16 %v233_v33, %v232_v32  ;;  %v362_v35 = vld [vmem:[#allocation5] sm:$0xff]  ;;  %v363_v36 = vld [vmem:[#allocation5 + $0x8] sm:$0xff]  ;;  %v364_v37 = vld [vmem:[#allocation5 + $0x10] sm:$0xff] }
  0x30   :  { %700 = vmatpush3.bf16.msra.mxu1 %v697_v11  ;;  %v725_v38 = vpack.c.bf16 %v363_v36, %v362_v35  ;;  %v365_v39 = vld [vmem:[#allocation5 + $0x18] sm:$0xff]  ;;  %v366_v41 = vld [vmem:[#allocation5 + $0x20] sm:$0xff]  ;;  %v367_v42 = vld [vmem:[#allocation5 + $0x28] sm:$0xff] }
  0x31   :  { %593 = vmatmul.mubr.msk.f32.gmra.mrb[2].mxu0 %vm72_vm0, %v58_v14  ;;  %702 = vmatprep.subr.bf16.mxu1 %v701_v15  ;;  %v729_v40 = vpack.c.bf16 %v365_v39, %v364_v37  ;;  %v733_v43 = vpack.c.bf16 %v367_v42, %v366_v41  ;;  %v368_v44 = vld [vmem:[#allocation5 + $0x30] sm:$0xff]  ;;  %v369_v45 = vld [vmem:[#allocation5 + $0x38] sm:$0xff]  ;;  %v370_v47 = vld [vmem:[#allocation5 + $0x40] sm:$0xff] }
  0x32   :  { %595 = vmatprep.mubr.msk.f32.mxu0 %vm72_vm0, %v59_v16  ;;  %726 = vmatprep.subr.bf16.mxu0 %v725_v38  ;;  %v737_v46 = vpack.c.bf16 %v369_v45, %v368_v44  ;;  %v371_v48 = vld [vmem:[#allocation5 + $0x48] sm:$0xff]  ;;  %v372_v50 = vld [vmem:[#allocation5 + $0x50] sm:$0xff]  ;;  %v373_v51 = vld [vmem:[#allocation5 + $0x58] sm:$0xff] }
  0x33   :  { %728 = vmatpush3.bf16.msra.mxu0 %v725_v38  ;;  %v741_v49 = vpack.c.bf16 %v371_v48, %v370_v47  ;;  %v745_v52 = vpack.c.bf16 %v373_v51, %v372_v50  ;;  %v516_v53 = vld [vmem:[%s973_s2] ss:$0 sm:$0xff]  ;;  %v375_v23 = vld [vmem:[#allocation5 + $0x68] sm:$0xff]  ;;  %v377_v26 = vld [vmem:[#allocation5 + $0x78] sm:$0xff] }
  0x34   :  { %704 = vmatpush3.bf16.msra.mxu1 %v701_v15  ;;  %730 = vmatprep.subr.bf16.mxu0 %v729_v40  ;;  %v374_v22 = vld [vmem:[#allocation5 + $0x60] sm:$0xff] }
  0x35   :  { %596 = vmatmul.mubr.msk.f32.gmra.mrb[4].mxu0 %vm72_vm0, %v60_v19  ;;  %706 = vmatprep.subr.bf16.mxu1 %v705_v20 }
  0x36   :  { %598 = vmatprep.mubr.msk.f32.mxu0 %vm72_vm0, %v61_v21 }
  0x37   :  { %732 = vmatpush3.bf16.msra.mxu0 %v729_v40 }
  0x38   :  { %708 = vmatpush3.bf16.msra.mxu1 %v705_v20  ;;  %734 = vmatprep.subr.bf16.mxu0 %v733_v43 }
  0x39   :  { %599 = vmatmul.mubr.msk.f32.gmra.mrb[6].mxu0 %vm72_vm0, %v62_v24  ;;  %710 = vmatprep.subr.bf16.mxu1 %v709_v25  ;;  %v749_v24 = vpack.c.bf16 %v375_v23, %v374_v22 }
  0x3b   :  { %736 = vmatpush3.bf16.msra.mxu0 %v733_v43 }
  0x3c   :  { %712 = vmatpush3.bf16.msra.mxu1 %v709_v25  ;;  %738 = vmatprep.subr.bf16.mxu0 %v737_v46  ;;  %v376_v25 = vld [vmem:[#allocation5 + $0x70] sm:$0xff] }
  0x3d   :  { %714 = vmatprep.subr.bf16.mxu1 %v713_v28  ;;  %v753_v27 = vpack.c.bf16 %v377_v26, %v376_v25 }
  0x3f   :  { %740 = vmatpush3.bf16.msra.mxu0 %v737_v46 }
  0x40   :  { %716 = vmatpush3.bf16.msra.mxu1 %v713_v28  ;;  %742 = vmatprep.subr.bf16.mxu0 %v741_v49  ;;  %v525_v28 = vld [vmem:[%s975_s4] ss:$0 sm:$0xff] }
  0x41   :  { %718 = vmatprep.subr.bf16.mxu1 %v717_v31 }
  0x43   :  { %744 = vmatpush3.bf16.msra.mxu0 %v741_v49 }
  0x44   :  { %720 = vmatpush3.bf16.msra.mxu1 %v717_v31  ;;  %746 = vmatprep.subr.bf16.mxu0 %v745_v52 }
  0x45   :  { %722 = vmatprep.subr.bf16.mxu1 %v721_v34 }
  0x47   :  { %748 = vmatpush3.bf16.msra.mxu0 %v745_v52 }
  0x48   :  { %724 = vmatpush3.bf16.msra.mxu1 %v721_v34  ;;  %750 = vmatprep.subr.bf16.mxu0 %v749_v24 }
  0x4b   :  { %752 = vmatpush3.bf16.msra.mxu0 %v749_v24 }
  0x4c   :  { %754 = vmatprep.subr.bf16.mxu0 %v753_v27 }
  0x4f   :  { %756 = vmatpush3.bf16.msra.mxu0 %v753_v27 }
 0x100   :  { %v591_v54 = vpop.f32.mrb[0].mxu0 }
 0x101   :  { %v169_v55 = vadd.f32 %v591_v54, %v516_v53  ;;  %v163_v56 = vpop.f32.mrb[1].mxu0 }
 0x102   :  { %v164_v57 = vadd.f32 %v516_v53, %v163_v56 }
 0x103   :  { %v203_v58 = vmul.f32 0.01, %v169_v55 }
 0x104   :  { %v594_v59 = vpop.f32.mrb[2].mxu0  ;;  %v202_v60 = vmul.f32 0.01, %v164_v57 }
 0x105   :  { %v179_v61 = vadd.f32 %v594_v59, %v516_v53  ;;  %v173_v62 = vpop.f32.mrb[3].mxu0  ;;  %v211_v1 = vmax.f32 %v169_v55, %v203_v58 }
 0x106   :  { %v174_v63 = vadd.f32 %v516_v53, %v173_v62  ;;  %v210_v0 = vmax.f32 %v164_v57, %v202_v60 }
 0x107   :  { %v205_v2 = vmul.f32 0.01, %v179_v61 }
 0x108   :  { %v204_v3 = vmul.f32 0.01, %v174_v63  ;;  %v597_v4 = vpop.f32.mrb[4].mxu0  ;;  %633 = vmatprep.mubr.f32.mxu1 %v210_v0 }
 0x109   :  { %v189_v5 = vadd.f32 %v597_v4, %v516_v53  ;;  %v183_v6 = vpop.f32.mrb[5].mxu0  ;;  %634 = vmatmul.mubr.f32.vlgmr.msra.gmra.mrb[0].mxu1 %v211_v1  ;;  %v213_v9 = vmax.f32 %v179_v61, %v205_v2  ;;  %v526_v61 = vld [vmem:[%s977_s6] ss:$0 sm:$0xff]  ;;  %s806_s6 = scalar_lea.vmem %s504_s26, 1024 }
 0x10a   :  { %v212_v7 = vmax.f32 %v174_v63, %v204_v3  ;;  %v184_v8 = vadd.f32 %v516_v53, %v183_v6  ;;  %p807_p2 = scmp.ne.s32.totalorder %s504_s26, %s806_s6  ;;  %p812_p4 = scmp.lt.s32.totalorder %s806_s6, %s806_s6 }
 0x10b   :  { %v207_v10 = vmul.f32 0.01, %v189_v5 }
 0x10c   :  { %v206_v11 = vmul.f32 0.01, %v184_v8  ;;  %v600_v12 = vpop.f32.mrb[6].mxu0  ;;  %636 = vmatprep.mubr.f32.mxu1 %v212_v7  ;;  %p813_p5 = por %p812_p4, %p811_p3 }
 0x10d   :  { %v199_v13 = vadd.f32 %v600_v12, %v516_v53  ;;  %v193_v14 = vpop.f32.mrb[7].mxu0  ;;  %637 = vmatmul.mubr.f32.gmra.mrb[2].mxu1 %v213_v9  ;;  %v215_v17 = vmax.f32 %v189_v5, %v207_v10 }
 0x10e   :  { %v214_v15 = vmax.f32 %v184_v8, %v206_v11  ;;  %v194_v16 = vadd.f32 %v516_v53, %v193_v14  ;;  %p814_p6 = pnand %p813_p5, %p807_p2 }
 0x10f   :  { %v209_v18 = vmul.f32 0.01, %v199_v13 }
 0x110   :  { %v208_v19 = vmul.f32 0.01, %v194_v16  ;;  %639 = vmatprep.mubr.f32.mxu1 %v214_v15 }
 0x111   :  { %640 = vmatmul.mubr.f32.gmra.mrb[4].mxu1 %v215_v17  ;;  %v217_v21 = vmax.f32 %v199_v13, %v209_v18 }
 0x112   :  { %v216_v20 = vmax.f32 %v194_v16, %v208_v19 }
 0x114   :  { %642 = vmatprep.mubr.f32.mxu1 %v216_v20 }
 0x115   :  { %643 = vmatmul.mubr.f32.gmra.mrb[6].mxu1 %v217_v21 }
 0x1dc   :  { %v635_v29 = vpop.f32.mrb[0].mxu1 }
 0x1dd   :  { %v313_v30 = vadd.f32 %v635_v29, %v525_v28  ;;  %v307_v31 = vpop.f32.mrb[1].mxu1 }
 0x1de   :  { %v308_v32 = vadd.f32 %v525_v28, %v307_v31 }
 0x1df   :  { %v347_v33 = vmul.f32 0.01, %v313_v30 }
 0x1e0   :  { %v346_v34 = vmul.f32 0.01, %v308_v32  ;;  %v638_v35 = vpop.f32.mrb[2].mxu1 }
 0x1e1   :  { %v323_v36 = vadd.f32 %v638_v35, %v525_v28  ;;  %v317_v37 = vpop.f32.mrb[3].mxu1  ;;  %v355_v40 = vmax.f32 %v313_v30, %v347_v33 }
 0x1e2   :  { %v354_v38 = vmax.f32 %v308_v32, %v346_v34  ;;  %v318_v39 = vadd.f32 %v525_v28, %v317_v37 }
 0x1e3   :  { %v349_v41 = vmul.f32 0.01, %v323_v36 }
 0x1e4   :  { %v348_v42 = vmul.f32 0.01, %v318_v39  ;;  %v641_v43 = vpop.f32.mrb[4].mxu1  ;;  %677 = vmatprep.mubr.f32.mxu0 %v354_v38 }
 0x1e5   :  { %v333_v44 = vadd.f32 %v641_v43, %v525_v28  ;;  %v327_v45 = vpop.f32.mrb[5].mxu1  ;;  %678 = vmatmul.mubr.f32.vlgmr.msra.gmra.mrb[8].mxu0 %v355_v40  ;;  %v357_v48 = vmax.f32 %v323_v36, %v349_v41 }
 0x1e6   :  { %v356_v46 = vmax.f32 %v318_v39, %v348_v42  ;;  %v328_v47 = vadd.f32 %v525_v28, %v327_v45 }
 0x1e7   :  { %v351_v49 = vmul.f32 0.01, %v333_v44 }
 0x1e8   :  { %v350_v50 = vmul.f32 0.01, %v328_v47  ;;  %v644_v51 = vpop.f32.mrb[6].mxu1  ;;  %680 = vmatprep.mubr.f32.mxu0 %v356_v46 }
 0x1e9   :  { %v343_v52 = vadd.f32 %v644_v51, %v525_v28  ;;  %v337_v53 = vpop.f32.mrb[7].mxu1  ;;  %681 = vmatmul.mubr.f32.gmra.mrb[10].mxu0 %v357_v48  ;;  %v359_v56 = vmax.f32 %v333_v44, %v351_v49 }
 0x1ea   :  { %v358_v54 = vmax.f32 %v328_v47, %v350_v50  ;;  %v338_v55 = vadd.f32 %v525_v28, %v337_v53 }
 0x1eb   :  { %v353_v57 = vmul.f32 0.01, %v343_v52 }
 0x1ec   :  { %v352_v58 = vmul.f32 0.01, %v338_v55  ;;  %683 = vmatprep.mubr.f32.mxu0 %v358_v54 }
 0x1ed   :  { %684 = vmatmul.mubr.f32.gmra.mrb[12].mxu0 %v359_v56  ;;  %v361_v60 = vmax.f32 %v343_v52, %v353_v57 }
 0x1ee   :  { %v360_v59 = vmax.f32 %v338_v55, %v352_v58 }
 0x1f0   :  { %686 = vmatprep.mubr.f32.mxu0 %v360_v59 }
 0x1f1   :  { %687 = vmatmul.mubr.f32.gmra.mrb[14].mxu0 %v361_v60 }
 0x2b8   :  { %v679_v62 = vpop.f32.mrb[8].mxu0 }
 0x2b9   :  { %v457_v63 = vadd.f32 %v679_v62, %v526_v61  ;;  %v451_v0 = vpop.f32.mrb[9].mxu0 }
 0x2ba   :  { %v452_v1 = vadd.f32 %v526_v61, %v451_v0 }
 0x2bb   :  { %491 = vst [vmem:[#allocation7 + $0x8] sm:$0xff] %v457_v63 }
 0x2bc   :  { %490 = vst [vmem:[#allocation7] sm:$0xff] %v452_v1  ;;  %v682_v2 = vpop.f32.mrb[10].mxu0 }
 0x2bd   :  { %v467_v3 = vadd.f32 %v682_v2, %v526_v61  ;;  %v461_v4 = vpop.f32.mrb[11].mxu0 }
 0x2be   :  { %v462_v5 = vadd.f32 %v526_v61, %v461_v4 }
 0x2bf   :  { %493 = vst [vmem:[#allocation7 + $0x18] sm:$0xff] %v467_v3 }
 0x2c0   :  { %492 = vst [vmem:[#allocation7 + $0x10] sm:$0xff] %v462_v5  ;;  %v685_v6 = vpop.f32.mrb[12].mxu0 }
 0x2c1   :  { %v477_v7 = vadd.f32 %v685_v6, %v526_v61  ;;  %v471_v8 = vpop.f32.mrb[13].mxu0 }
 0x2c2   :  { %v472_v9 = vadd.f32 %v526_v61, %v471_v8 }
 0x2c3   :  { %495 = vst [vmem:[#allocation7 + $0x28] sm:$0xff] %v477_v7 }
 0x2c4   :  { %494 = vst [vmem:[#allocation7 + $0x20] sm:$0xff] %v472_v9  ;;  %v688_v10 = vpop.f32.mrb[14].mxu0 }
 0x2c5   :  { %v487_v11 = vadd.f32 %v688_v10, %v526_v61  ;;  %v481_v12 = vpop.f32.mrb[15].mxu0 }
 0x2c6   :  { %v482_v13 = vadd.f32 %v526_v61, %v481_v12 }
 0x2c7   :  { %497 = vst [vmem:[#allocation7 + $0x38] sm:$0xff] %v487_v11 }
 0x2c8   :  { %496 = vst [vmem:[#allocation7 + $0x30] sm:$0xff] %v482_v13 }
 0x2c9   :  { %817 = shalt.err (!%p814_p6)
}
 0x2ca   :  { %s818_s29 = scalar_lea.hbm %s978_s7, 1024 }
 0x2cb   :  { %p819_p7 = scmp.ne.s32.totalorder %s978_s7, %s818_s29  ;;  %p822_p8 = scmp.lt.u32.totalorder %s818_s29, %s978_s7 }
 0x2cd   :  { %p824_p9 = pnand %p822_p8, %p819_p7 }
 0x2cf   :  { %827 = shalt.err (!%p824_p9)
}
 0x2d0   :  { %509 = dma.vmem_to_hbm [thread:$0]  %s504_s26, 1024, %s978_s7, [#allocation4], %s835_s11, %s835_s11, %s836_s12  }
 0x2d1   :  { %832 = dma.done.wait [#allocation4], 1024  }
 0x2d2   :  { %833 = vsyncadd [#allocation4], 4294966272 }
 0x2d3   :  { %513 = vsyncpa [#allocation3], 1 }
 0x2d4   :  { %514 = vsyncpa [#allocation6], 1 }
 0x2d5   :  { %515 = vsyncpa [#allocation4], 1 }

</bundles_post_ra>
